<compile_context>
chip_gen: v7x
topology: tpu7x:2x2x1
jax: 0.10.0
libtpu: 0.0.40
codegen_flags: <defaults>
</compile_context>

<pallas_src>
import jax
import jax.numpy as jnp
from jax.experimental import pallas as pl
from jax.experimental.pallas import tpu as pltpu

LANE = 128
NUM_SPLITS = 2                      # leading "parallel" axis: both TCs on v7x
MAX_TILE_BYTES = 2 * 1024 * 1024    # per-input tile; 2 in x 2 bufs x 2 MiB = 8 MiB VMEM


def _cdiv(a: int, b: int) -> int:
    return (a + b - 1) // b


def _round_up(x: int, m: int) -> int:
    return _cdiv(x, m) * m


def _make_l1_kernel(k_steps: int, tr: int, rows_total: int, needs_mask: bool):
    def kernel(sr_ref, hr_ref, out_ref):
        # Output block index depends only on the parallel axis -> it stays
        # resident in VMEM across the reduction ("arbitrary") axis and acts
        # as an (8,128) vector accumulator.
        @pl.when(pl.program_id(1) == 0)
        def _():
            out_ref[...] = jnp.zeros_like(out_ref)

        diff = jnp.abs(sr_ref[...].astype(jnp.float32)
                       - hr_ref[...].astype(jnp.float32))

        if needs_mask:
            # Zero out rows past the true end of the flattened input (the
            # boundary block's out-of-range rows hold unspecified values).
            # Pure VPU work; fully hidden under the HBM stream.
            row_start = (pl.program_id(0) * k_steps + pl.program_id(1)) * tr
            row_ids = row_start + jax.lax.broadcasted_iota(jnp.int32, (tr, 1), 0)
            diff = jnp.where(row_ids < rows_total, diff, 0.0)

        # Vector-shaped partial sum: summing over the leading (vreg-stacked)
        # axis is pure VPU adds; the expensive cross-lane reduce happens once,
        # in the epilogue outside the kernel.
        out_ref[0] += jnp.sum(diff.reshape(tr // 8, 8, LANE), axis=0)

    return kernel


def l1_loss_pallas(SR, HR):
    """Computes mean(|SR - HR|) — semantics of torch.nn.L1Loss() (reduction='mean')."""
    assert SR.shape == HR.shape, "SR and HR must have the same shape"
    n_elems = int(SR.size)
    itemsize = jnp.dtype(SR.dtype).itemsize
    sublane_align = max(8, 32 // itemsize)      # f32: 8, bf16: 16, int8/fp8: 32

    sr_flat = SR.reshape(-1)
    hr_flat = HR.reshape(-1)

    rows_total = _cdiv(n_elems, LANE)
    lane_padded = rows_total * LANE
    if lane_padded != n_elems:
        # Minimal (<128-element) zero pad so the flat->2D reshape exists;
        # |0-0| adds nothing and the mean divides by the ORIGINAL count.
        # TODO(synk): this rare path costs one extra XLA copy of the inputs.
        sr_flat = jnp.pad(sr_flat, (0, lane_padded - n_elems))
        hr_flat = jnp.pad(hr_flat, (0, lane_padded - n_elems))
    sr2 = sr_flat.reshape(rows_total, LANE)
    hr2 = hr_flat.reshape(rows_total, LANE)

    # Tiling: biggest aligned row tile under the per-input VMEM cap.
    max_tr = max(sublane_align,
                 (MAX_TILE_BYTES // (LANE * itemsize)) // sublane_align * sublane_align)
    splits = NUM_SPLITS if rows_total >= NUM_SPLITS * sublane_align else 1
    rows_per_core = _cdiv(rows_total, splits)
    tr = min(max_tr, _round_up(rows_per_core, sublane_align))
    k = _cdiv(rows_per_core, tr)                 # reduction steps per core
    num_blocks = _cdiv(rows_total, tr)
    last_block = num_blocks - 1
    needs_mask = splits * k * tr != rows_total   # ragged tail somewhere?

    def in_map(c, i):
        blk = c * k + i
        if needs_mask:
            # Clamp so a (fully masked-out) trailing grid step never issues a
            # DMA whose window starts past the end of the array; Pallas skips
            # the repeated copy since the block index does not change.
            blk = jnp.minimum(blk, last_block)
        return (blk, 0)

    partials = pl.pallas_call(
        _make_l1_kernel(k, tr, rows_total, needs_mask),
        out_shape=jax.ShapeDtypeStruct((splits, 8, LANE), jnp.float32),
        grid_spec=pltpu.PrefetchScalarGridSpec(
            num_scalar_prefetch=0,
            grid=(splits, k),
            in_specs=[
                pl.BlockSpec((tr, LANE), in_map),
                pl.BlockSpec((tr, LANE), in_map),
            ],
            out_specs=pl.BlockSpec((1, 8, LANE), lambda c, i: (c, 0, 0)),
        ),
        compiler_params=pltpu.CompilerParams(
            dimension_semantics=("parallel", "arbitrary"),  # split axis / reduction
        ),
    )(sr2, hr2)

    # Tiny epilogue: reduce splits*8*128 partials and divide by the ORIGINAL count.
    return jnp.sum(partials) / n_elems


if __name__ == "__main__":
    key = jax.random.PRNGKey(0)
    k_sr, k_hr, k_sr2, k_hr2, k_sr3, k_hr3 = jax.random.split(key, 6)

    # 1) NCHW image tensors, element count a multiple of 128 (zero-copy path).
    SR = jax.random.normal(k_sr, (2, 4, 16, 16), dtype=jnp.float32)
    HR = jax.random.normal(k_hr, (2, 4, 16, 16), dtype=jnp.float32)
    loss = jax.block_until_ready(l1_loss_pallas(SR, HR))
    ref = jnp.mean(jnp.abs(SR - HR))
    assert jnp.allclose(loss, ref, rtol=1e-5, atol=1e-6), (loss, ref)

    # 2) Ragged shape: exercises the minimal lane pad + boundary-row mask path.
    SR2 = jax.random.normal(k_sr2, (1, 3, 50, 37), dtype=jnp.float32)
    HR2 = jax.random.normal(k_hr2, (1, 3, 50, 37), dtype=jnp.float32)
    loss2 = jax.block_until_ready(l1_loss_pallas(SR2, HR2))
    ref2 = jnp.mean(jnp.abs(SR2 - HR2))
    assert jnp.allclose(loss2, ref2, rtol=1e-5, atol=1e-6), (loss2, ref2)

    # 3) bf16 inputs: exercises the 16-row sublane alignment / single-split path.
    SR3 = jax.random.normal(k_sr3, (2, 4, 16, 16), dtype=jnp.bfloat16)
    HR3 = jax.random.normal(k_hr3, (2, 4, 16, 16), dtype=jnp.bfloat16)
    loss3 = jax.block_until_ready(l1_loss_pallas(SR3, HR3))
    ref3 = jnp.mean(jnp.abs(SR3.astype(jnp.float32) - HR3.astype(jnp.float32)))
    assert jnp.allclose(loss3, ref3, rtol=1e-5, atol=1e-6), (loss3, ref3)

    print("KERNEL_OK")
</pallas_src>

<mosaic_0001>
module attributes {stable_mosaic.version = 11 : i64} {
  func.func @kernel(%arg0: i32, %arg1: i32, %arg2: memref<8x128xf32, #tpu.memory_space<vmem>>, %arg3: memref<8x128xf32, #tpu.memory_space<vmem>>, %arg4: memref<1x8x128xf32, #tpu.memory_space<vmem>>) attributes {dimension_semantics = [#tpu.dimension_semantics<parallel>, #tpu.dimension_semantics<arbitrary>], iteration_bounds = array<i64: 2, 1>, scalar_prefetch = 0 : i64, scratch_operands = 0 : i64, tpu.core_type = #tpu.core_type<tc>, window_params = [{transform_indices = @transform_0, window_bounds = array<i64: 8, 128>}, {transform_indices = @transform_1, window_bounds = array<i64: 8, 128>}, {transform_indices = @transform_2, window_bounds = array<i64: 1, 8, 128>}]} {
    %c0_i32 = arith.constant 0 : i32
    %0 = arith.cmpi eq, %arg1, %c0_i32 : i32
    %1 = arith.extui %0 : i1 to i32
    %c0_i32_0 = arith.constant 0 : i32
    %2 = arith.cmpi ne, %1, %c0_i32_0 : i32
    scf.if %2 {
      %cst_10 = arith.constant 0.000000e+00 : f32
      %15 = vector.broadcast %cst_10 : f32 to vector<1x8x128xf32>
      %c0_11 = arith.constant 0 : index
      %c0_12 = arith.constant 0 : index
      %c0_13 = arith.constant 0 : index
      %16 = vector.load %arg4[%c0_11, %c0_12, %c0_13] : memref<1x8x128xf32, #tpu.memory_space<vmem>>, vector<1x8x128xf32>
      tpu.vector_store %arg4[%c0_11, %c0_12, %c0_13], %15 {strides = array<i32>} : memref<1x8x128xf32, #tpu.memory_space<vmem>>, vector<1x8x128xf32>,
    } else {
    }
    %c0 = arith.constant 0 : index
    %c0_1 = arith.constant 0 : index
    %3 = vector.load %arg2[%c0, %c0_1] : memref<8x128xf32, #tpu.memory_space<vmem>>, vector<8x128xf32>
    %c0_2 = arith.constant 0 : index
    %c0_3 = arith.constant 0 : index
    %4 = vector.load %arg3[%c0_2, %c0_3] : memref<8x128xf32, #tpu.memory_space<vmem>>, vector<8x128xf32>
    %5 = arith.subf %3, %4 : vector<8x128xf32>
    %6 = math.absf %5 : vector<8x128xf32>
    %c0_4 = arith.constant 0 : index
    %c0_5 = arith.constant 0 : index
    %c0_6 = arith.constant 0 : index
    %7 = vector.load %arg4[%c0_4, %c0_5, %c0_6] : memref<1x8x128xf32, #tpu.memory_space<vmem>>, vector<1x8x128xf32>
    %8 = vector.shape_cast %7 : vector<1x8x128xf32> to vector<8x128xf32>
    %9 = vector.shape_cast %6 : vector<8x128xf32> to vector<1x8x128xf32>
    %cst = arith.constant dense<0.000000e+00> : vector<8x128xf32>
    %10 = vector.multi_reduction <add>, %9, %cst [0] : vector<1x8x128xf32> to vector<8x128xf32>
    %11 = arith.addf %8, %10 : vector<8x128xf32>
    %c0_7 = arith.constant 0 : index
    %c0_8 = arith.constant 0 : index
    %c0_9 = arith.constant 0 : index
    %12 = vector.load %arg4[%c0_7, %c0_8, %c0_9] : memref<1x8x128xf32, #tpu.memory_space<vmem>>, vector<1x8x128xf32>
    %13 = vector.shape_cast %12 : vector<1x8x128xf32> to vector<8x128xf32>
    %14 = vector.shape_cast %11 : vector<8x128xf32> to vector<1x8x128xf32>
    tpu.vector_store %arg4[%c0_7, %c0_8, %c0_9], %14 {strides = array<i32>} : memref<1x8x128xf32, #tpu.memory_space<vmem>>, vector<1x8x128xf32>,
    return
  }
  func.func @transform_0(%arg0: i32, %arg1: i32) -> (i32, i32) {
    %c1_i32 = arith.constant 1 : i32
    %0 = arith.muli %arg0, %c1_i32 : i32
    %1 = arith.addi %0, %arg1 : i32
    %c0_i32 = arith.constant 0 : i32
    %c0_i32_0 = arith.constant 0 : i32
    return %1, %c0_i32 : i32, i32
  }
  func.func @transform_1(%arg0: i32, %arg1: i32) -> (i32, i32) {
    %c1_i32 = arith.constant 1 : i32
    %0 = arith.muli %arg0, %c1_i32 : i32
    %1 = arith.addi %0, %arg1 : i32
    %c0_i32 = arith.constant 0 : i32
    %c0_i32_0 = arith.constant 0 : i32
    return %1, %c0_i32 : i32, i32
  }
  func.func @transform_2(%arg0: i32, %arg1: i32) -> (i32, i32, i32) {
    %c0_i32 = arith.constant 0 : i32
    %c0_i32_0 = arith.constant 0 : i32
    %c0_i32_1 = arith.constant 0 : i32
    return %arg0, %c0_i32, %c0_i32_0 : i32, i32, i32
  }
}

</mosaic_0001>

<bundles_post_ra>
// kernel: tpu_custom_call.1
= control target key start
LH: loop header
LB: loop body
LE: loop exit
PB: predicated region body
PF: predicated region fallthrough
CT: control target
= control target key end

     0   :  { %7 = vsyncpa [#allocation3], 0  ;;  %s816_s0 = inlined_call_operand.hbm [shape: f32[16,128], index: 0, kind: input, shape index: {}]   ;;  %s817_s1 = inlined_call_operand.hbm [shape: f32[16,128], index: 1, kind: input, shape index: {}]   ;;  %s818_s2 = inlined_call_operand.hbm [shape: f32[2,8,128], index: 2, kind: output, shape index: {}]  }
   0x1   :  { %9 = vsyncpa [#allocation3 + $0x1], 0 }
   0x2   :  { %10 = vsyncpa [#allocation6], 0 }
   0x3   :  { %12 = vsyncpa [#allocation6 + $0x1], 0 }
   0x4   :  { %13 = vsyncpa [#allocation4], 0 }
   0x5   :  { %15 = vsyncpa [#allocation4 + $0x1], 0  ;;  %s596_s9 = smov 0   ;;  %s598_s10 = smov 0  }
   0x6   :  { %s600_s11 = smov 0   ;;  %s602_s12 = smov 0  }
   0x7   :  { %s604_s13 = smov 0   ;;  %s606_s14 = smov 0  }
   0x8 LB: > { %s346_s15 = sadd.s32 4294967295, %s576_s14   ;;  %s347_s16 = sadd.s32 4294967294, %s576_s14   ;;  %s576_s14 = sphi %s606_s14, %s21_s14   ;;  %s572_s13 = sphi %s604_s13, %s838_s13   ;;  %s568_s12 = sphi %s602_s12, %s837_s12   ;;  %s564_s11 = sphi %s600_s11, %s836_s11   ;;  %s560_s10 = sphi %s598_s10, %s835_s10   ;;  %s556_s9 = sphi %s596_s9, %s834_s9  }
   0x9   : > { %s33_s17 = sadd.s32 1, %s572_s13  ;;  %s42_s18 = sadd.s32 1, %s564_s11 }
   0xa   : > { %p35_p0 = scmp.ge.s32.totalorder %s33_s17, 2  ;;  %p49_p1 = scmp.ne.s32.totalorder %s564_s11, %s560_s10 }
   0xb   : > { %p50_p2 = scmp.eq.s32.totalorder %s576_s14, 0  ;;  %p55_p3 = scmp.ne.s32.totalorder %s560_s10, %s556_s9 }
   0xc   : > { %s840_s17 = smov (%p35_p0, %s33_s17), 0  ;;  %p56_p5 = scmp.eq.s32.totalorder %s346_s15, 0 }
   0xd   : > { %p637_p4 = por %p50_p2, %p49_p1  ;;  %s39_s20 = ssub.s32 %s572_s13, %s840_s17 }
   0xe   : > { %p107_p6 = scmp.eq.s32.totalorder %s346_s15, 1  ;;  %p40_p7 = scmp.eq.s32.totalorder %s39_s20, 0 }
   0xf   : > { %p643_p8 = por %p56_p5, %p55_p3  ;;  %p113_p10 = scmp.eq.s32.totalorder %s347_s16, 1 }
  0x10   : > { %p647_p9 = por %p107_p6, %p49_p1  ;;  %p379_p13 = scmp.lt.s32.totalorder %s576_s14, 2 }
  0x11   : > { %s822_s21 = scalar_select %p643_p8, 1, 0 }
  0x12   : > { %s823_s22 = scalar_select %p647_p9, 1, 0 }
  0x13   : > { %s652_s23 = scalar_select %p40_p7, %s564_s11, %s42_s18  }
  0x14   : > { %p654_p11 = por %p113_p10, %p55_p3  ;;  %s661_s25 = sand.u32 1, %s564_s11  }
  0x15   : > { %s350_s26 = sshll.u32 %s661_s25, 3  ;;  %s351_s27 = sshll.u32 %s572_s13, 7 }
  0x16   : > { %s824_s24 = scalar_select %p654_p11, 1, 0 }
  0x17   : > { %s670_s30 = scalar_lea.hbm %s816_s0, %s351_s27  ;;  %s137_s3 = scalar_lea.vmem [#allocation2], %s350_s26 }
  0x18   : > { %s145_s4 = sshll.u32 %s137_s3, 4  ;;  %p678_p0 = pnand %p379_p13, %p637_p4  ;;  %s674_s4 = int_to_ptr.vmem [resolvable:$true] %s145_s4 }
  0x19   : > { %s134_s6 = scalar_lea.sflag [#allocation3], %s661_s25  ;;  %s430_s7 = scalar_lea.hbm %s670_s30, 128 }
  0x1a   : > { %p431_p3 = scmp.ne.s32.totalorder %s670_s30, %s430_s7  ;;  %p432_p5 = pneg %p678_p0 }
  0x1b   : > { %s435_s16 = scalar_lea.hbm %s816_s0, 256  ;;  %p436_p4 = scmp.lt.u32.totalorder %s670_s30, %s816_s0 }
  0x1c   : > { %p433_p6 = pnand %p432_p5, %p431_p3  ;;  %p437_p10 = scmp.lt.u32.totalorder %s435_s16, %s430_s7 }
  0x1d   : > { %p439_p12 = scmp.lt.u32.totalorder %s430_s7, %s670_s30 }
  0x1e   : > { %p434_p7 = pneg %p433_p6  ;;  %p438_p13 = por %p437_p10, %p436_p4 }
  0x20   : > { %p440_p1 = por %p439_p12, %p438_p13 }
  0x22   : > { %p441_p2 = pnand %p440_p1, %p434_p7 }
  0x24   : > { %444 = shalt.err (!%p441_p2)
}
  0x25   : > { %s445_s20 = scalar_lea.vmem %s674_s4, 128  ;;  %s578_s28 = smov [#allocation2]  }
  0x26   : > { %p446_p3 = scmp.ne.s32.totalorder %s674_s4, %s445_s20  ;;  %s450_s29 = sshll.u32 %s578_s28, 4  ;;  %s451_s29 = int_to_ptr.vmem [resolvable:$false] %s450_s29 }
  0x27   : > { %s452_s3 = scalar_lea.vmem %s451_s29, 256  ;;  %p453_p9 = scmp.lt.s32.totalorder %s674_s4, %s451_s29 }
  0x28   : > { %p448_p6 = pnand %p446_p3, %p432_p5  ;;  %p454_p4 = scmp.lt.s32.totalorder %s452_s3, %s445_s20 }
  0x2a   : > { %p449_p11 = pneg %p448_p6  ;;  %p455_p10 = por %p454_p4, %p453_p9 }
  0x2c   : > { %p456_p12 = pnand %p455_p10, %p449_p11 }
  0x2e   : > { %459 = shalt.err (!%p456_p12)
}
  0x2f   : > { %371 = dma.hbm_to_vmem [thread:$0]  (!%p678_p0), %s670_s30, 128, %s674_s4, %s134_s6  }
  0x30   : > { %p826_p1 = scmp.lt.s32.totalorder %s576_s14, 3  ;;  %p827_p2 = scmp.ge.s32.totalorder %s576_s14, 1 }
  0x31   : > { %s723_s16 = scalar_lea.hbm %s817_s1, %s351_s27  ;;  %s156_s18 = scalar_lea.vmem [#allocation5], %s350_s26 }
  0x32   : > { %p714_p7 = pnand %p827_p2, %p826_p1  ;;  %s164_s19 = sshll.u32 %s156_s18, 4  ;;  %s165_s19 = int_to_ptr.vmem [resolvable:$true] %s164_s19 }
  0x33   : > { %s153_s30 = scalar_lea.sflag [#allocation6], %s661_s25  ;;  %s460_s4 = scalar_lea.hbm %s723_s16, 128 }
  0x34   : > { %s828_s7 = scalar_select %p714_p7, 1, 0 }
  0x35   : > { %p461_p9 = scmp.ne.s32.totalorder %s723_s16, %s460_s4  ;;  %s465_s27 = scalar_lea.hbm %s817_s1, 256 }
  0x36   : > { %p466_p3 = scmp.lt.u32.totalorder %s723_s16, %s817_s1  ;;  %p467_p6 = scmp.lt.u32.totalorder %s465_s27, %s460_s4 }
  0x37   : > { %p463_p11 = pnand %p461_p9, %p432_p5  ;;  %p469_p10 = scmp.lt.u32.totalorder %s460_s4, %s723_s16 }
  0x38   : > { %p468_p4 = por %p467_p6, %p466_p3 }
  0x39   : > { %p464_p13 = pneg %p463_p11 }
  0x3a   : > { %p470_p12 = por %p469_p10, %p468_p4 }
  0x3c   : > { %p471_p1 = pnand %p470_p12, %p464_p13 }
  0x3e   : > { %474 = shalt.err (!%p471_p1)
}
  0x3f   : > { %s475_s25 = scalar_lea.vmem %s165_s19, 128  ;;  %s579_s26 = smov [#allocation5]  }
  0x40   : > { %p476_p2 = scmp.ne.s32.totalorder %s165_s19, %s475_s25  ;;  %s480_s3 = sshll.u32 %s579_s26, 4  ;;  %s481_s3 = int_to_ptr.vmem [resolvable:$false] %s480_s3 }
  0x41   : > { %s482_s8 = scalar_lea.vmem %s481_s3, 256  ;;  %p483_p8 = scmp.lt.s32.totalorder %s165_s19, %s481_s3 }
  0x42   : > { %p478_p9 = pnand %p476_p2, %p432_p5  ;;  %p484_p7 = scmp.lt.s32.totalorder %s482_s8, %s475_s25 }
  0x44   : > { %p479_p11 = pneg %p478_p9  ;;  %p485_p3 = por %p484_p7, %p483_p8 }
  0x46   : > { %p486_p6 = pnand %p485_p3, %p479_p11 }
  0x48   : > { %489 = shalt.err (!%p486_p6)
}
  0x49   : > { %374 = dma.hbm_to_vmem [thread:$0]  (!%p678_p0), %s723_s16, 128, %s165_s19, %s153_s30  }
  0x4a   : > { %p829_p13 = scmp.ne.s32.totalorder %s828_s7, 0 }
  0x4b   : > { %s750_s15 = sand.u32 (!%p829_p13), 1, %s560_s10   ;;  %p830_p5 = scmp.ne.s32.totalorder (!%p829_p13), %s822_s21, 0 }
  0x4c   : > { %173 = sbr.rel (%p829_p13) target bundleno = 112 (0x70), region = 28  ;;  %s355_s18 = sshll.u32 (!%p829_p13), %s750_s15, 3 }
  0x4d   : > { %s176_s4 = scalar_lea.sflag (!%p829_p13), [#allocation3], %s750_s15  ;;  %s179_s6 = scalar_lea.vmem (!%p829_p13), [#allocation2], %s355_s18 }
  0x53   : > { %543 = dma.done.wait (%p830_p5), %s176_s4, 128  }
  0x54   : > { %545 = vsyncadd (%p830_p5), %s176_s4, 4294967168  ;;  %s185_s5 = scalar_lea.sflag [#allocation6], %s750_s15  ;;  %s188_s16 = scalar_lea.vmem [#allocation5], %s355_s18 }
  0x55   : > { %547 = dma.done.wait (%p830_p5), %s185_s5, 128  }
  0x56   : > { %549 = vsyncadd (%p830_p5), %s185_s5, 4294967168  ;;  %v221_v0 = vld [vmem:[%s179_s6] sm:$0xff]  ;;  %v222_v1 = vld [vmem:[%s188_s16] sm:$0xff]  ;;  %s359_s7 = sshll.u32 %s568_s12, 7  ;;  %s213_s19 = scalar_lea.vmem [#allocation7], %s355_s18 }
  0x57   : > { %v223_v2 = vsub.f32 %v221_v0, %v222_v1  ;;  %s243_s30 = sshll.u32 %s213_s19, 4  ;;  %s767_s28 = scalar_lea.hbm %s818_s2, %s359_s7  ;;  %s769_s30 = int_to_ptr.vmem [resolvable:$true] %s243_s30 }
  0x58   : > { %s230_s21 = scalar_lea.sflag [#allocation4], %s750_s15  ;;  %s490_s29 = scalar_lea.vmem %s769_s30, 128 }
  0x59   : > { %v224_v3 = vand.u32 2147483647, %v223_v2  ;;  %p491_p8 = scmp.ne.s32.totalorder %s769_s30, %s490_s29  ;;  %p831_p0 = scmp.ne.s32.totalorder %s823_s22, 0 }
  0x5a   : > { %s580_s12 = smov [#allocation7]  }
  0x5b   : > { %228 = vst [vmem:[%s213_s19] sm:$0xff] %v224_v3  ;;  %p492_p7 = pnand %p491_p8, %p831_p0  ;;  %s494_s25 = sshll.u32 %s580_s12, 4  ;;  %s495_s25 = int_to_ptr.vmem [resolvable:$false] %s494_s25 }
  0x5c   : > { %s496_s26 = scalar_lea.vmem %s495_s25, 256  ;;  %p497_p10 = scmp.lt.s32.totalorder %s769_s30, %s495_s25 }
  0x5d   : > { %p493_p4 = pneg %p492_p7  ;;  %p498_p12 = scmp.lt.s32.totalorder %s496_s26, %s490_s29 }
  0x5f   : > { %p499_p1 = por %p498_p12, %p497_p10 }
  0x61   : > { %p500_p2 = pnand %p499_p1, %p493_p4 }
  0x63   : > { %503 = shalt.err (!%p500_p2)
}
  0x64   : > { %s504_s3 = scalar_lea.hbm %s767_s28, 128  ;;  %s508_s18 = scalar_lea.hbm %s818_s2, 256 }
  0x65   : > { %p505_p9 = scmp.ne.s32.totalorder %s767_s28, %s504_s3  ;;  %p509_p6 = scmp.lt.u32.totalorder %s767_s28, %s818_s2 }
  0x66   : > { %p510_p13 = scmp.lt.u32.totalorder %s508_s18, %s504_s3  ;;  %p512_p8 = scmp.lt.u32.totalorder %s504_s3, %s767_s28 }
  0x67   : > { %p506_p11 = pnand %p505_p9, %p831_p0 }
  0x68   : > { %p511_p5 = por %p510_p13, %p509_p6 }
  0x69   : > { %p507_p3 = pneg %p506_p11 }
  0x6a   : > { %p513_p7 = por %p512_p8, %p511_p5 }
  0x6c   : > { %p514_p4 = pnand %p513_p7, %p507_p3 }
  0x6e   : > { %517 = shalt.err (!%p514_p4)
}
  0x6f   : > { %366 = dma.vmem_to_hbm [thread:$0]  (%p831_p0), %s769_s30, 128, %s767_s28, %s230_s21  }
  0x70 PF: > { %s255_s5 = sand.u32 1, %s556_s9   ;;  %p832_p10 = scmp.ne.s32.totalorder %s824_s24, 0 }
  0x71   : > { %p833_p12 = scmp.ge.s32.totalorder %s576_s14, 2  ;;  %s256_s16 = scalar_lea.sflag [#allocation4], %s255_s5 }
  0x73   : > { %p376_p1 = pnand %p833_p12, %p832_p10 }
  0x75   : > { %551 = dma.done.wait (!%p376_p1), %s256_s16, 128  }
  0x76   : > { %553 = vsyncadd (!%p376_p1), %s256_s16, 4294967168  ;;  %s21_s14 = sadd.s32 1, %s576_s14   ;;  %s834_s9 = smov %s560_s10 }
  0x77   : > { %p18_p2 = scmp.ge.s32.totalorder %s21_s14, 4   ;;  %s835_s10 = smov %s564_s11 }
  0x78   : > { %s836_s11 = smov %s652_s23  ;;  %s837_s12 = smov %s572_s13 }
  0x79   : > { %s838_s13 = smov %s840_s17  ;;  %20 = sbr.rel (!%p18_p2) target bundleno = 8 (0x8), region = 90 }
  0x80   :  { %261 = vsyncpa [#allocation3], 1 }
  0x81   :  { %263 = vsyncpa [#allocation3 + $0x1], 1 }
  0x82   :  { %264 = vsyncpa [#allocation6], 1 }
  0x83   :  { %266 = vsyncpa [#allocation6 + $0x1], 1 }
  0x84   :  { %267 = vsyncpa [#allocation4], 1 }
  0x85   :  { %269 = vsyncpa [#allocation4 + $0x1], 1 }

</bundles_post_ra>
